<compile_context>
chip_gen: v6e
topology: v6e:2x2x1
jax: 0.10.0
libtpu: 0.0.40
codegen_flags: <defaults>
</compile_context>

<pallas_src>
import functools

import jax
import jax.numpy as jnp
from jax.experimental import pallas as pl
from jax.experimental.pallas import tpu as pltpu


_LANE = 128
_MAX_ROW_LEN = 4096                      # max lane width per folded row
_TARGET_BLOCK_BYTES = 2 * 1024 * 1024    # per-buffer tile target (x4 with in/out double buffering)


def _preemphasis_kernel(x_ref, prev_ref, o_ref, *, coef: float):
    """One (TB, C) tile of the folded slab.

    y[r, c] = x[r, c] - coef * x[r, c-1]     for c >= 1
    y[r, 0] = x[r, 0] - coef * prev[r]       prev supplied by the wrapper:
                                             reflect sample (x[b,1]) for the first fold-row
                                             of a batch element, last sample of the previous
                                             fold-row otherwise.
    """
    x = x_ref[...]                                    # (TB, C)
    shifted = pltpu.roll(x, shift=1, axis=1)          # shifted[:, c] = x[:, c-1]; col 0 = wrap junk
    o_ref[...] = x - coef * shifted                   # lane-dense full-tile store
    # patch only lane 0 with the externally supplied previous sample
    o_ref[:, 0:1] = x[:, 0:1] - coef * prev_ref[...]


def _choose_row_len(batch: int, t_pad: int) -> int:
    """Folded row length C: a multiple of 128 dividing t_pad, <= _MAX_ROW_LEN, preferring
    the largest C that still yields >= 8 total rows (full sublane occupancy)."""
    cands = [c for c in range(_LANE, min(_MAX_ROW_LEN, t_pad) + 1, _LANE) if t_pad % c == 0]
    good = [c for c in cands if batch * (t_pad // c) >= 8]
    return max(good) if good else max(cands)


def pre_emphasis(x: jax.Array, coef: float = 0.97, squeeze_output: bool = False,
                 row_block: int | None = None) -> jax.Array:
    """Matches PreEmphasis.forward: x is (B, T).

    Returns (B, 1, T) if squeeze_output is False (PyTorch default), else (B, T).
    `row_block` optionally overrides the auto row-tile size (multiple of 8), for tuning/tests.
    """
    assert x.ndim == 2, f"Expect input has 2 dimensions, got {x.ndim}"
    B, T = x.shape
    assert T >= 2, "reflect padding needs at least 2 samples"
    dtype = x.dtype

    # --- layout: pad T to a lane multiple, fold time into rows so sublanes are full ---
    t_pad = ((T + _LANE - 1) // _LANE) * _LANE
    x_work = x if t_pad == T else jnp.pad(x, ((0, 0), (0, t_pad - T)))
    C = _choose_row_len(B, t_pad)
    F = t_pad // C
    rows = B * F

    x3 = x_work.reshape(B, F, C)                       # metadata-only
    # previous sample for column 0 of every folded row (tiny strided gather)
    reflect = x3[:, :1, 1]                             # (B, 1): x[b, 1]  (reflect pad)
    carry = x3[:, :-1, C - 1]                          # (B, F-1): x[b, f*C - 1]
    prev_first = jnp.concatenate([reflect, carry], axis=1).reshape(rows, 1)
    slab = x3.reshape(rows, C)                         # metadata-only

    # --- row tiling ---
    if row_block is None:
        tb = max(8, (_TARGET_BLOCK_BYTES // (C * dtype.itemsize)) // 8 * 8)
        tb = rows if rows <= tb else tb
    else:
        assert row_block == rows or row_block % 8 == 0, \
            "row_block must be a multiple of 8 (or the full row count)"
        tb = min(row_block, rows)

    grid = (pl.cdiv(rows, tb),)

    out = pl.pallas_call(
        functools.partial(_preemphasis_kernel, coef=float(coef)),
        out_shape=jax.ShapeDtypeStruct((rows, C), dtype),
        grid=grid,
        in_specs=[
            pl.BlockSpec((tb, C), lambda i: (i, 0)),   # main slab tile
            pl.BlockSpec((tb, 1), lambda i: (i, 0)),   # per-row column-0 predecessor
        ],
        out_specs=pl.BlockSpec((tb, C), lambda i: (i, 0)),
        compiler_params=pltpu.CompilerParams(dimension_semantics=("parallel",)),
    )(slab, prev_first)

    y = out.reshape(B, t_pad)
    if t_pad != T:
        y = y[:, :T]
    if squeeze_output:
        return y
    return y[:, None, :]                               # (B, 1, T), metadata-only view


def _reference(x: jax.Array, coef: float = 0.97) -> jax.Array:
    # pure-JAX reference of reflect-pad + conv1d([-coef, 1.0])
    prev = jnp.concatenate([x[:, 1:2], x[:, :-1]], axis=1)
    return x - coef * prev


if __name__ == "__main__":
    key = jax.random.PRNGKey(0)
    coef = 0.97

    cases = [
        # (B, T, row_block)
        (2, 4096, None),     # fold path: rows=8, single lane-dense tile
        (2, 65536, 8),       # forced multi-tile grid over rows (4 pipelined steps)
        (2, 1000, None),     # T not a multiple of 128 -> pad-and-fold path
        (3, 384, None),      # odd row count (block == full row dim)
        (2, 128, None),      # tiny case matching the original test
    ]
    for idx, (B, T, rb) in enumerate(cases):
        key, sub = jax.random.split(key)
        x = jax.random.normal(sub, (B, T), dtype=jnp.float32)
        ref = _reference(x, coef)

        y = jax.block_until_ready(pre_emphasis(x, coef=coef, squeeze_output=False, row_block=rb))
        assert y.shape == (B, 1, T), (y.shape, (B, 1, T))
        assert jnp.allclose(y[:, 0, :], ref, atol=1e-6, rtol=1e-6), f"mismatch in case {idx}"

        y_sq = jax.block_until_ready(pre_emphasis(x, coef=coef, squeeze_output=True, row_block=rb))
        assert y_sq.shape == (B, T), y_sq.shape
        assert jnp.allclose(y_sq, ref, atol=1e-6, rtol=1e-6), f"mismatch (squeezed) in case {idx}"

    print("KERNEL_OK")
</pallas_src>

<mosaic_0001>
module attributes {stable_mosaic.version = 11 : i64} {
  func.func @_preemphasis_kernel(%arg0: i32, %arg1: memref<8x1024xf32, #tpu.memory_space<vmem>>, %arg2: memref<8x1xf32, #tpu.memory_space<vmem>>, %arg3: memref<8x1024xf32, #tpu.memory_space<vmem>>) attributes {dimension_semantics = [#tpu.dimension_semantics<parallel>], iteration_bounds = array<i64: 1>, scalar_prefetch = 0 : i64, scratch_operands = 0 : i64, tpu.core_type = #tpu.core_type<tc>, window_params = [{transform_indices = @transform_0, window_bounds = array<i64: 8, 1024>}, {transform_indices = @transform_1, window_bounds = array<i64: 8, 1>}, {transform_indices = @transform_2, window_bounds = array<i64: 8, 1024>}]} {
    %c0 = arith.constant 0 : index
    %c0_0 = arith.constant 0 : index
    %0 = vector.load %arg1[%c0, %c0_0] : memref<8x1024xf32, #tpu.memory_space<vmem>>, vector<8x1024xf32>
    %c1_i32 = arith.constant 1 : i32
    %1 = tpu.dynamic_rotate %0 by %c1_i32 dim 1 : vector<8x1024xf32>, i32 -> vector<8x1024xf32>
    %cst = arith.constant 9.700000e-01 : f32
    %2 = vector.broadcast %cst : f32 to vector<8x1024xf32>
    %3 = arith.mulf %2, %1 : vector<8x1024xf32>
    %4 = arith.subf %0, %3 : vector<8x1024xf32>
    %c0_1 = arith.constant 0 : index
    %c0_2 = arith.constant 0 : index
    %5 = vector.load %arg3[%c0_1, %c0_2] : memref<8x1024xf32, #tpu.memory_space<vmem>>, vector<8x1024xf32>
    tpu.vector_store %arg3[%c0_1, %c0_2], %4 {strides = array<i32>} : memref<8x1024xf32, #tpu.memory_space<vmem>>, vector<8x1024xf32>,
    %6 = vector.extract_strided_slice %0 {offsets = [0, 0], sizes = [8, 1], strides = [1, 1]} : vector<8x1024xf32> to vector<8x1xf32>
    %c0_3 = arith.constant 0 : index
    %c0_4 = arith.constant 0 : index
    %7 = vector.load %arg2[%c0_3, %c0_4] : memref<8x1xf32, #tpu.memory_space<vmem>>, vector<8x1xf32>
    %cst_5 = arith.constant 9.700000e-01 : f32
    %8 = vector.broadcast %cst_5 : f32 to vector<8x1xf32>
    %9 = arith.mulf %8, %7 : vector<8x1xf32>
    %10 = arith.subf %6, %9 : vector<8x1xf32>
    %c0_6 = arith.constant 0 : index
    %c0_7 = arith.constant 0 : index
    %11 = vector.load %arg3[%c0_6, %c0_7] : memref<8x1024xf32, #tpu.memory_space<vmem>>, vector<8x1xf32>
    tpu.vector_store %arg3[%c0_6, %c0_7], %10 {strides = array<i32>} : memref<8x1024xf32, #tpu.memory_space<vmem>>, vector<8x1xf32>,
    return
  }
  func.func @transform_0(%arg0: i32) -> (i32, i32) {
    %c0_i32 = arith.constant 0 : i32
    %c0_i32_0 = arith.constant 0 : i32
    return %arg0, %c0_i32 : i32, i32
  }
  func.func @transform_1(%arg0: i32) -> (i32, i32) {
    %c0_i32 = arith.constant 0 : i32
    %c0_i32_0 = arith.constant 0 : i32
    return %arg0, %c0_i32 : i32, i32
  }
  func.func @transform_2(%arg0: i32) -> (i32, i32) {
    %c0_i32 = arith.constant 0 : i32
    %c0_i32_0 = arith.constant 0 : i32
    return %arg0, %c0_i32 : i32, i32
  }
}

</mosaic_0001>

<bundles_post_ra>
// kernel: tpu_custom_call.1
= control target key start
LH: loop header
LB: loop body
LE: loop exit
PB: predicated region body
PF: predicated region fallthrough
CT: control target
= control target key end

     0   :  { %7 = vsyncpa [#allocation3], 0  ;;  %s185_s0 = inlined_call_operand.hbm [shape: f32[8,1024], index: 0, kind: input, shape index: {}]   ;;  %s186_s1 = inlined_call_operand.vmem [shape: f32[8,1], index: 1, kind: input, shape index: {}]   ;;  %s187_s2 = inlined_call_operand.hbm [shape: f32[8,1024], index: 2, kind: output, shape index: {}]  }
   0x1   :  { %8 = vsyncpa [#allocation4], 0  ;;  %s150_s9 = smov [#allocation2]  }
   0x2   :  { %s15_s10 = sshll.u32 %s150_s9, 4  ;;  %s16_s10 = int_to_ptr.vmem [resolvable:$true] %s15_s10 }
   0x3   :  { %s114_s11 = scalar_lea.vmem %s16_s10, 1024  ;;  %p119_p1 = scmp.lt.s32.totalorder %s16_s10, %s16_s10 }
   0x4   :  { %p115_p0 = scmp.ne.s32.totalorder %s16_s10, %s114_s11  ;;  %p120_p2 = scmp.lt.s32.totalorder %s114_s11, %s114_s11 }
   0x6   :  { %p121_p3 = por %p120_p2, %p119_p1 }
   0x8   :  { %p122_p4 = pnand %p121_p3, %p115_p0 }
   0xa   :  { %125 = shalt.err (!%p122_p4)
}
   0xb   :  { %18 = dma.hbm_to_vmem [thread:$0]  %s185_s0, 1024, %s16_s10, [#allocation3]  }
   0xc   :  { %146 = dma.done.wait [#allocation3], 1024  }
   0xd   :  { %147 = vsyncadd [#allocation3], 4294966272  ;;  %v25_v0 = vld [vmem:[#allocation2 + $0x8] sm:$0xff]  ;;  %v24_v1 = vld [vmem:[#allocation2] sm:$0xff]  ;;  %s151_s14 = smov 1   ;;  %v48_v8 = vlaneseq  ;;  %vm86_vm1 = vcmask 7168  }
   0xe   :  { %34 = vrot.lane.b32.xlu1 %v25_v0, %s151_s14  ;;  %32 = vrot.lane.b32.xlu0 %v24_v1, %s151_s14  ;;  %v26_v2 = vld [vmem:[#allocation2 + $0x10] sm:$0xff]  ;;  %v31_v3 = vld [vmem:[#allocation2 + $0x38] sm:$0xff]  ;;  %v28_v4 = vld [vmem:[#allocation2 + $0x20] sm:$0xff] }
   0xf   :  { %v27_v5 = vld [vmem:[#allocation2 + $0x18] sm:$0xff]  ;;  %v30_v6 = vld [vmem:[#allocation2 + $0x30] sm:$0xff]  ;;  %v29_v7 = vld [vmem:[#allocation2 + $0x28] sm:$0xff]  ;;  %v49_v9 = vand.u32 127, %v48_v8 }
  0x10   :  { %v83_v10 = vld [vmem:[%s186_s1] sm:$0xff]  ;;  %s152_s1 = smov [#allocation5]  }
  0x11   :  { %vm50_vm0 = vcmp.lt.s32.totalorder %v49_v9, 1  ;;  %v84_v15 = vmul.f32 0.97, %v83_v10  ;;  %s94_s16 = sshll.u32 %s152_s1, 4  ;;  %s95_s16 = int_to_ptr.vmem [resolvable:$true] %s94_s16 }
  0x12   :  { %36 = vrot.lane.b32.xlu1 %v26_v2, %s151_s14  ;;  %46 = vrot.lane.b32.xlu0 %v31_v3, %s151_s14  ;;  %s126_s17 = scalar_lea.vmem %s95_s16, 1024  ;;  %p131_p6 = scmp.lt.s32.totalorder %s95_s16, %s95_s16 }
  0x13   :  { %v85_v23 = vsub.f32 %v24_v1, %v84_v15  ;;  %p127_p5 = scmp.ne.s32.totalorder %s95_s16, %s126_s17  ;;  %p132_p7 = scmp.lt.s32.totalorder %s126_s17, %s126_s17 }
  0x15   :  { %p133_p8 = por %p132_p7, %p131_p6 }
  0x16   :  { %40 = vrot.lane.b32.xlu1 %v28_v4, %s151_s14  ;;  %38 = vrot.lane.b32.xlu0 %v27_v5, %s151_s14 }
  0x17   :  { %p134_p9 = pnand %p133_p8, %p127_p5 }
  0x1a   :  { %44 = vrot.lane.b32.xlu1 %v30_v6, %s151_s14  ;;  %42 = vrot.lane.b32.xlu0 %v29_v7, %s151_s14 }
  0x80   :  { %v35_v11 = vpop.permute.xlu1 %34  ;;  %v33_v12 = vpop.permute.xlu0 %32 }
  0x81   :  { %v57_v13 = vsel %vm50_vm0, %v33_v12, %v35_v11 }
  0x82   :  { %v60_v14 = vmul.f32 0.97, %v57_v13 }
  0x84   :  { %v68_v16 = vsub.f32 %v25_v0, %v60_v14  ;;  %v37_v17 = vpop.permute.xlu1 %36  ;;  %v47_v18 = vpop.permute.xlu0 %46 }
  0x85   :  { %v56_v19 = vsel %vm50_vm0, %v35_v11, %v37_v17  ;;  %v58_v20 = vsel %vm50_vm0, %v47_v18, %v33_v12 }
  0x86   :  { %76 = vst [vmem:[#allocation5 + $0x8] sm:$0xff] %v68_v16  ;;  %v61_v21 = vmul.f32 0.97, %v56_v19  ;;  %v59_v22 = vmul.f32 0.97, %v58_v20 }
  0x88   :  { %v69_v24 = vsub.f32 %v26_v2, %v61_v21  ;;  %v67_v25 = vsub.f32 %v24_v1, %v59_v22  ;;  %v41_v26 = vpop.permute.xlu1 %40  ;;  %v39_v27 = vpop.permute.xlu0 %38 }
  0x89   :  { %v54_v28 = vsel %vm50_vm0, %v39_v27, %v41_v26  ;;  %v55_v29 = vsel %vm50_vm0, %v37_v17, %v39_v27 }
  0x8a   :  { %77 = vst [vmem:[#allocation5 + $0x10] sm:$0xff] %v69_v24  ;;  %75 = vst [vmem:[#allocation5] sm:$0xff] %v67_v25  ;;  %v62_v30 = vmul.f32 0.97, %v55_v29  ;;  %v63_v31 = vmul.f32 0.97, %v54_v28 }
  0x8b   :  { %87 = vst.msk [vmem:[#allocation5] sm:$0xff] %vm86_vm1, %v85_v23 }
  0x8c   :  { %v70_v32 = vsub.f32 %v27_v5, %v62_v30  ;;  %v71_v33 = vsub.f32 %v28_v4, %v63_v31  ;;  %v45_v34 = vpop.permute.xlu1 %44  ;;  %v43_v35 = vpop.permute.xlu0 %42 }
  0x8d   :  { %v51_v36 = vsel %vm50_vm0, %v45_v34, %v47_v18  ;;  %v52_v37 = vsel %vm50_vm0, %v43_v35, %v45_v34  ;;  %v53_v38 = vsel %vm50_vm0, %v41_v26, %v43_v35 }
  0x8e   :  { %78 = vst [vmem:[#allocation5 + $0x18] sm:$0xff] %v70_v32  ;;  %79 = vst [vmem:[#allocation5 + $0x20] sm:$0xff] %v71_v33  ;;  %v66_v39 = vmul.f32 0.97, %v51_v36  ;;  %v64_v40 = vmul.f32 0.97, %v53_v38 }
  0x8f   :  { %v65_v41 = vmul.f32 0.97, %v52_v37 }
  0x90   :  { %v74_v42 = vsub.f32 %v31_v3, %v66_v39  ;;  %v72_v43 = vsub.f32 %v29_v7, %v64_v40 }
  0x91   :  { %v73_v44 = vsub.f32 %v30_v6, %v65_v41 }
  0x92   :  { %82 = vst [vmem:[#allocation5 + $0x38] sm:$0xff] %v74_v42  ;;  %80 = vst [vmem:[#allocation5 + $0x28] sm:$0xff] %v72_v43 }
  0x93   :  { %81 = vst [vmem:[#allocation5 + $0x30] sm:$0xff] %v73_v44 }
  0x94   :  { %137 = shalt.err (!%p134_p9)
}
  0x95   :  { %97 = dma.vmem_to_hbm [thread:$0]  %s95_s16, 1024, %s187_s2, [#allocation4]  }
  0x96   :  { %148 = dma.done.wait [#allocation4], 1024  }
  0x97   :  { %149 = vsyncadd [#allocation4], 4294966272 }
  0x98   :  { %101 = vsyncpa [#allocation3], 1 }
  0x99   :  { %102 = vsyncpa [#allocation4], 1 }

</bundles_post_ra>
